<compile_context>
chip_gen: v5e
topology: v5e:2x2
jax: 0.10.0
libtpu: 0.0.40
codegen_flags: <defaults>
</compile_context>

<pallas_src>
import functools

import jax
import jax.numpy as jnp
from jax.experimental import pallas as pl
from jax.experimental.pallas import tpu as pltpu

EPS = 1e-5
NEG_LARGE = -1e30  # only used as the masked-out value inside the row-max


def _actor_kernel(x_ref,
                  w1_ref, g1_ref, be1_ref,
                  w2_ref, g2_ref, be2_ref,
                  w3_ref, b3_ref,
                  out_ref, *, out_dim):
    x = x_ref[...]

    # ---- layer 1: Linear (bias cancels under BN) + BatchNorm1d (batch stats) + ReLU ----
    h = jnp.dot(x, w1_ref[...], preferred_element_type=jnp.float32)
    mean = jnp.mean(h, axis=0, keepdims=True)
    hc = h - mean
    var = jnp.mean(hc * hc, axis=0, keepdims=True)          # biased variance
    h = jnp.maximum(hc * jax.lax.rsqrt(var + EPS) * g1_ref[...] + be1_ref[...], 0.0)

    # ---- layer 2: Linear (bias cancels under BN) + BatchNorm1d (batch stats) + ReLU ----
    h = jnp.dot(h, w2_ref[...], preferred_element_type=jnp.float32)
    mean = jnp.mean(h, axis=0, keepdims=True)
    hc = h - mean
    var = jnp.mean(hc * hc, axis=0, keepdims=True)
    h = jnp.maximum(hc * jax.lax.rsqrt(var + EPS) * g2_ref[...] + be2_ref[...], 0.0)

    # ---- output layer: Linear + masked softmax over lane-dense padded feature dim ----
    logits = jnp.dot(h, w3_ref[...], preferred_element_type=jnp.float32) + b3_ref[...]
    col = jax.lax.broadcasted_iota(jnp.int32, logits.shape, 1)
    valid = col < out_dim
    m = jnp.max(jnp.where(valid, logits, NEG_LARGE), axis=1, keepdims=True)
    e = jnp.where(valid, jnp.exp(logits - m), 0.0)           # pad lanes exactly 0
    denom = jnp.sum(e, axis=1, keepdims=True)
    out_ref[...] = e * (1.0 / denom)                          # exact normalization


@jax.jit
def actor_forward(x, params):
    """x: [B, input_dim] float32; params: dict (see init_params)."""
    B = x.shape[0]
    out_dim = params["w3"].shape[1]

    # Lane-dense output: pad the final feature dim up to a multiple of 128 (with zeros;
    # the kernel masks the pad lanes explicitly).
    pad_out = ((out_dim + 127) // 128) * 128
    w3p = jnp.pad(params["w3"], ((0, 0), (0, pad_out - out_dim)))
    b3p = jnp.pad(params["b3"], ((0, 0), (0, pad_out - out_dim)))

    # b1/b2 intentionally NOT passed: they are exact no-ops under batch-stat BatchNorm.
    args = (x,
            params["w1"], params["g1"], params["be1"],
            params["w2"], params["g2"], params["be2"],
            w3p, b3p)

    vmem = pl.BlockSpec(memory_space=pltpu.MemorySpace.VMEM)
    out_padded = pl.pallas_call(
        functools.partial(_actor_kernel, out_dim=out_dim),
        out_shape=jax.ShapeDtypeStruct((B, pad_out), jnp.float32),
        in_specs=[vmem] * len(args),
        out_specs=vmem,
    )(*args)

    return out_padded[:, :out_dim]


def init_params(key, input_dim, output_dim, hidden_dim):
    """Mirror nn.Linear default init (uniform +-1/sqrt(fan_in)); BN gamma=1, beta=0."""
    ks = jax.random.split(key, 6)

    def linear(kw, kb, fan_in, fan_out):
        bound = 1.0 / jnp.sqrt(jnp.float32(fan_in))
        w = jax.random.uniform(kw, (fan_in, fan_out), jnp.float32, -bound, bound)
        b = jax.random.uniform(kb, (1, fan_out), jnp.float32, -bound, bound)
        return w, b

    w1, b1 = linear(ks[0], ks[1], input_dim, hidden_dim)
    w2, b2 = linear(ks[2], ks[3], hidden_dim, hidden_dim)
    w3, b3 = linear(ks[4], ks[5], hidden_dim, output_dim)

    return {
        "w1": w1, "b1": b1,   # b1/b2 kept for PyTorch parity; unused by the kernel
        "g1": jnp.ones((1, hidden_dim), jnp.float32),
        "be1": jnp.zeros((1, hidden_dim), jnp.float32),
        "w2": w2, "b2": b2,
        "g2": jnp.ones((1, hidden_dim), jnp.float32),
        "be2": jnp.zeros((1, hidden_dim), jnp.float32),
        "w3": w3, "b3": b3,
    }


def _reference_forward(x, p):
    """Pure-JAX reference with the ORIGINAL PyTorch math (biases included)."""
    h = x @ p["w1"] + p["b1"]
    m = h.mean(0, keepdims=True); v = ((h - m) ** 2).mean(0, keepdims=True)
    h = jnp.maximum((h - m) / jnp.sqrt(v + EPS) * p["g1"] + p["be1"], 0.0)
    h = h @ p["w2"] + p["b2"]
    m = h.mean(0, keepdims=True); v = ((h - m) ** 2).mean(0, keepdims=True)
    h = jnp.maximum((h - m) / jnp.sqrt(v + EPS) * p["g2"] + p["be2"], 0.0)
    logits = h @ p["w3"] + p["b3"]
    return jax.nn.softmax(logits, axis=1)


if __name__ == "__main__":
    input_dim, output_dim, hidden_dim = 16, 8, 32
    batch = 8

    key = jax.random.PRNGKey(0)
    kx, kp = jax.random.split(key)
    x = jax.random.normal(kx, (batch, input_dim), jnp.float32)
    params = init_params(kp, input_dim, output_dim, hidden_dim)

    out = actor_forward(x, params)
    out = jax.block_until_ready(out)

    ref = _reference_forward(x, params)
    assert out.shape == (batch, output_dim)
    assert jnp.allclose(jnp.sum(out, axis=1), 1.0, atol=1e-3), "rows do not sum to 1"
    assert jnp.allclose(out, ref, atol=5e-3), "mismatch vs reference"

    print("KERNEL_OK")
</pallas_src>

<mosaic_0001>
module attributes {stable_mosaic.version = 11 : i64} {
  func.func @_actor_kernel(%arg0: memref<8x16xf32, #tpu.memory_space<vmem>>, %arg1: memref<16x32xf32, #tpu.memory_space<vmem>>, %arg2: memref<1x32xf32, #tpu.memory_space<vmem>>, %arg3: memref<1x32xf32, #tpu.memory_space<vmem>>, %arg4: memref<32x32xf32, #tpu.memory_space<vmem>>, %arg5: memref<1x32xf32, #tpu.memory_space<vmem>>, %arg6: memref<1x32xf32, #tpu.memory_space<vmem>>, %arg7: memref<32x128xf32, #tpu.memory_space<vmem>>, %arg8: memref<1x128xf32, #tpu.memory_space<vmem>>, %arg9: memref<8x128xf32, #tpu.memory_space<vmem>>) attributes {dimension_semantics = [], scalar_prefetch = 0 : i64, scratch_operands = 0 : i64, tpu.core_type = #tpu.core_type<tc>} {
    %c0 = arith.constant 0 : index
    %c0_0 = arith.constant 0 : index
    %0 = vector.load %arg0[%c0, %c0_0] : memref<8x16xf32, #tpu.memory_space<vmem>>, vector<8x16xf32>
    %c0_1 = arith.constant 0 : index
    %c0_2 = arith.constant 0 : index
    %1 = vector.load %arg1[%c0_1, %c0_2] : memref<16x32xf32, #tpu.memory_space<vmem>>, vector<16x32xf32>
    %cst = arith.constant dense<0.000000e+00> : vector<8x32xf32>
    %2 = tpu.matmul %0, %1, %cst {dimension_numbers = #tpu.dot_dimension_numbers<[1], [0], [0], [1], [0, 0, 1, 1], [], []>} : vector<8x16xf32>, vector<16x32xf32>, vector<8x32xf32> -> vector<8x32xf32>
    %cst_3 = arith.constant dense<0.000000e+00> : vector<32xf32>
    %3 = vector.multi_reduction <add>, %2, %cst_3 [0] : vector<8x32xf32> to vector<32xf32>
    %4 = vector.shape_cast %3 : vector<32xf32> to vector<1x32xf32>
    %cst_4 = arith.constant 8.000000e+00 : f32
    %5 = vector.broadcast %cst_4 : f32 to vector<1x32xf32>
    %6 = arith.divf %4, %5 : vector<1x32xf32>
    %7 = vector.broadcast %6 : vector<1x32xf32> to vector<8x32xf32>
    %8 = arith.subf %2, %7 : vector<8x32xf32>
    %9 = arith.mulf %8, %8 : vector<8x32xf32>
    %cst_5 = arith.constant dense<0.000000e+00> : vector<32xf32>
    %10 = vector.multi_reduction <add>, %9, %cst_5 [0] : vector<8x32xf32> to vector<32xf32>
    %11 = vector.shape_cast %10 : vector<32xf32> to vector<1x32xf32>
    %cst_6 = arith.constant 8.000000e+00 : f32
    %12 = vector.broadcast %cst_6 : f32 to vector<1x32xf32>
    %13 = arith.divf %11, %12 : vector<1x32xf32>
    %cst_7 = arith.constant 9.99999974E-6 : f32
    %14 = vector.broadcast %cst_7 : f32 to vector<1x32xf32>
    %15 = arith.addf %13, %14 : vector<1x32xf32>
    %16 = math.rsqrt %15 : vector<1x32xf32>
    %17 = vector.broadcast %16 : vector<1x32xf32> to vector<8x32xf32>
    %18 = arith.mulf %8, %17 : vector<8x32xf32>
    %c0_8 = arith.constant 0 : index
    %c0_9 = arith.constant 0 : index
    %19 = vector.load %arg2[%c0_8, %c0_9] : memref<1x32xf32, #tpu.memory_space<vmem>>, vector<1x32xf32>
    %20 = vector.broadcast %19 : vector<1x32xf32> to vector<8x32xf32>
    %21 = arith.mulf %18, %20 : vector<8x32xf32>
    %c0_10 = arith.constant 0 : index
    %c0_11 = arith.constant 0 : index
    %22 = vector.load %arg3[%c0_10, %c0_11] : memref<1x32xf32, #tpu.memory_space<vmem>>, vector<1x32xf32>
    %23 = vector.broadcast %22 : vector<1x32xf32> to vector<8x32xf32>
    %24 = arith.addf %21, %23 : vector<8x32xf32>
    %cst_12 = arith.constant 0.000000e+00 : f32
    %25 = vector.broadcast %cst_12 : f32 to vector<8x32xf32>
    %26 = arith.maximumf %24, %25 : vector<8x32xf32>
    %c0_13 = arith.constant 0 : index
    %c0_14 = arith.constant 0 : index
    %27 = vector.load %arg4[%c0_13, %c0_14] : memref<32x32xf32, #tpu.memory_space<vmem>>, vector<32x32xf32>
    %cst_15 = arith.constant dense<0.000000e+00> : vector<8x32xf32>
    %28 = tpu.matmul %26, %27, %cst_15 {dimension_numbers = #tpu.dot_dimension_numbers<[1], [0], [0], [1], [0, 0, 1, 1], [], []>} : vector<8x32xf32>, vector<32x32xf32>, vector<8x32xf32> -> vector<8x32xf32>
    %cst_16 = arith.constant dense<0.000000e+00> : vector<32xf32>
    %29 = vector.multi_reduction <add>, %28, %cst_16 [0] : vector<8x32xf32> to vector<32xf32>
    %30 = vector.shape_cast %29 : vector<32xf32> to vector<1x32xf32>
    %cst_17 = arith.constant 8.000000e+00 : f32
    %31 = vector.broadcast %cst_17 : f32 to vector<1x32xf32>
    %32 = arith.divf %30, %31 : vector<1x32xf32>
    %33 = vector.broadcast %32 : vector<1x32xf32> to vector<8x32xf32>
    %34 = arith.subf %28, %33 : vector<8x32xf32>
    %35 = arith.mulf %34, %34 : vector<8x32xf32>
    %cst_18 = arith.constant dense<0.000000e+00> : vector<32xf32>
    %36 = vector.multi_reduction <add>, %35, %cst_18 [0] : vector<8x32xf32> to vector<32xf32>
    %37 = vector.shape_cast %36 : vector<32xf32> to vector<1x32xf32>
    %cst_19 = arith.constant 8.000000e+00 : f32
    %38 = vector.broadcast %cst_19 : f32 to vector<1x32xf32>
    %39 = arith.divf %37, %38 : vector<1x32xf32>
    %cst_20 = arith.constant 9.99999974E-6 : f32
    %40 = vector.broadcast %cst_20 : f32 to vector<1x32xf32>
    %41 = arith.addf %39, %40 : vector<1x32xf32>
    %42 = math.rsqrt %41 : vector<1x32xf32>
    %43 = vector.broadcast %42 : vector<1x32xf32> to vector<8x32xf32>
    %44 = arith.mulf %34, %43 : vector<8x32xf32>
    %c0_21 = arith.constant 0 : index
    %c0_22 = arith.constant 0 : index
    %45 = vector.load %arg5[%c0_21, %c0_22] : memref<1x32xf32, #tpu.memory_space<vmem>>, vector<1x32xf32>
    %46 = vector.broadcast %45 : vector<1x32xf32> to vector<8x32xf32>
    %47 = arith.mulf %44, %46 : vector<8x32xf32>
    %c0_23 = arith.constant 0 : index
    %c0_24 = arith.constant 0 : index
    %48 = vector.load %arg6[%c0_23, %c0_24] : memref<1x32xf32, #tpu.memory_space<vmem>>, vector<1x32xf32>
    %49 = vector.broadcast %48 : vector<1x32xf32> to vector<8x32xf32>
    %50 = arith.addf %47, %49 : vector<8x32xf32>
    %cst_25 = arith.constant 0.000000e+00 : f32
    %51 = vector.broadcast %cst_25 : f32 to vector<8x32xf32>
    %52 = arith.maximumf %50, %51 : vector<8x32xf32>
    %c0_26 = arith.constant 0 : index
    %c0_27 = arith.constant 0 : index
    %53 = vector.load %arg7[%c0_26, %c0_27] : memref<32x128xf32, #tpu.memory_space<vmem>>, vector<32x128xf32>
    %cst_28 = arith.constant dense<0.000000e+00> : vector<8x128xf32>
    %54 = tpu.matmul %52, %53, %cst_28 {dimension_numbers = #tpu.dot_dimension_numbers<[1], [0], [0], [1], [0, 0, 1, 1], [], []>} : vector<8x32xf32>, vector<32x128xf32>, vector<8x128xf32> -> vector<8x128xf32>
    %c0_29 = arith.constant 0 : index
    %c0_30 = arith.constant 0 : index
    %55 = vector.load %arg8[%c0_29, %c0_30] : memref<1x128xf32, #tpu.memory_space<vmem>>, vector<1x128xf32>
    %56 = vector.broadcast %55 : vector<1x128xf32> to vector<8x128xf32>
    %57 = arith.addf %54, %56 : vector<8x128xf32>
    %58 = tpu.iota {dimensions = array<i32: 1>} : vector<8x128xi32>
    %c8_i32 = arith.constant 8 : i32
    %59 = vector.broadcast %c8_i32 : i32 to vector<8x128xi32>
    %60 = arith.cmpi slt, %58, %59 : vector<8x128xi32>
    %cst_31 = arith.constant -1.000000e+30 : f32
    %61 = vector.broadcast %cst_31 : f32 to vector<8x128xf32>
    %62 = arith.select %60, %57, %61 : vector<8x128xi1>, vector<8x128xf32>
    %cst_32 = arith.constant dense<0xFF800000> : vector<8xf32>
    %63 = vector.multi_reduction <maximumf>, %62, %cst_32 [1] : vector<8x128xf32> to vector<8xf32>
    %64 = vector.shape_cast %63 : vector<8xf32> to vector<8x1xf32>
    %65 = vector.broadcast %64 : vector<8x1xf32> to vector<8x128xf32>
    %66 = arith.subf %57, %65 : vector<8x128xf32>
    %67 = math.exp %66 : vector<8x128xf32>
    %cst_33 = arith.constant 0.000000e+00 : f32
    %68 = vector.broadcast %cst_33 : f32 to vector<8x128xf32>
    %69 = arith.select %60, %67, %68 : vector<8x128xi1>, vector<8x128xf32>
    %cst_34 = arith.constant dense<0.000000e+00> : vector<8xf32>
    %70 = vector.multi_reduction <add>, %69, %cst_34 [1] : vector<8x128xf32> to vector<8xf32>
    %71 = vector.shape_cast %70 : vector<8xf32> to vector<8x1xf32>
    %cst_35 = arith.constant 1.000000e+00 : f32
    %72 = vector.broadcast %cst_35 : f32 to vector<8x1xf32>
    %73 = arith.divf %72, %71 : vector<8x1xf32>
    %74 = vector.broadcast %73 : vector<8x1xf32> to vector<8x128xf32>
    %75 = arith.mulf %69, %74 : vector<8x128xf32>
    %c0_36 = arith.constant 0 : index
    %c0_37 = arith.constant 0 : index
    %76 = vector.load %arg9[%c0_36, %c0_37] : memref<8x128xf32, #tpu.memory_space<vmem>>, vector<8x128xf32>
    tpu.vector_store %arg9[%c0_36, %c0_37], %75 {strides = array<i32>} : memref<8x128xf32, #tpu.memory_space<vmem>>, vector<8x128xf32>,
    return
  }
}

</mosaic_0001>

<bundles_post_ra>
// kernel: actor_forward.1
= control target key start
LH: loop header
LB: loop body
LE: loop exit
PB: predicated region body
PF: predicated region fallthrough
CT: control target
= control target key end

     0   :  { %vm36_vm0 = vcmask 130048   ;;  %s414_s0 = inlined_call_operand.vmem [shape: f32[8,16], index: 0, kind: input, shape index: {}]   ;;  %s415_s1 = inlined_call_operand.vmem [shape: f32[16,32], index: 1, kind: input, shape index: {}]   ;;  %s416_s2 = inlined_call_operand.vmem [shape: f32[1,32], index: 2, kind: input, shape index: {}]   ;;  %s417_s3 = inlined_call_operand.vmem [shape: f32[1,32], index: 3, kind: input, shape index: {}]   ;;  %s418_s4 = inlined_call_operand.vmem [shape: f32[32,32], index: 4, kind: input, shape index: {}]   ;;  %s419_s5 = inlined_call_operand.vmem [shape: f32[1,32], index: 5, kind: input, shape index: {}]   ;;  %s420_s6 = inlined_call_operand.vmem [shape: f32[1,32], index: 6, kind: input, shape index: {}]   ;;  %s421_s7 = inlined_call_operand.vmem [shape: f32[32,128], index: 7, kind: input, shape index: {}]   ;;  %s422_s8 = inlined_call_operand.vmem [shape: f32[1,128], index: 8, kind: input, shape index: {}]   ;;  %s423_s9 = inlined_call_operand.hbm [shape: f32[8,128], index: 9, kind: output, shape index: {}]  }
   0x1   :  { %v35_v0 = vld [vmem:[%s415_s1 + $0x8] sm:$0xff]  ;;  %v34_v1 = vld [vmem:[%s415_s1] sm:$0xff] }
   0x2   :  { %v33_v2 = vld [vmem:[%s414_s0] sm:$0xff]  ;;  %54 = vmatpush.msra.mxu0 %v35_v0 }
   0x3   :  { %14 = vsyncpa [#allocation3], 0  ;;  %v299_v3 = vmov 8.0   ;;  %vm60_vm1 = vcmask 261120   ;;  %v112_v24 = vld [vmem:[%s418_s4 + $0x18] sm:$0xff]  ;;  %v111_v26 = vld [vmem:[%s418_s4 + $0x10] sm:$0xff] }
   0x4   :  { %55 = vmatpush.msra.mxu0 %v34_v1  ;;  %263 = vrcp.f32 %v299_v3  ;;  %128 = vmatpush.msra.mxu1 %v112_v24  ;;  %v110_v27 = vld [vmem:[%s418_s4 + $0x8] sm:$0xff]  ;;  %v109_v29 = vld [vmem:[%s418_s4] sm:$0xff]  ;;  %v180_v61 = vld [vmem:[%s421_s7 + $0x18] sm:$0xff]  ;;  %s244_s0 = sshll.u32 %s423_s9, 4  ;;  %s245_s0 = int_to_ptr.hbm [resolvable:$true] %s244_s0 }
   0x5   :  { %253 = vmatmul.msk.f32.vlgmr.msra.gmra.mxu0 %vm36_vm0, %v33_v2  ;;  %v258_v40 = vld [vmem:[%s416_s2] ss:$0 sm:$0xff]  ;;  %200 = vmatpush.msra.mxu2 %v180_v61  ;;  %v179_v63 = vld [vmem:[%s421_s7 + $0x10] sm:$0xff]  ;;  %v178_v0 = vld [vmem:[%s421_s7 + $0x8] sm:$0xff] }
   0x6   :  { %129 = vmatpush.msra.mxu1 %v111_v26  ;;  %v259_v43 = vld [vmem:[%s417_s3] ss:$0 sm:$0xff] }
   0x7   :  { %201 = vmatpush.msra.mxu2 %v179_v63  ;;  %v177_v2 = vld [vmem:[%s421_s7] sm:$0xff] }
   0x8   :  { %130 = vmatpush.msra.mxu1 %v110_v27 }
   0x9   :  { %202 = vmatpush.msra.mxu2 %v178_v0 }
   0xa   :  { %v264_v4 = vpop.eup %263  ;;  %131 = vmatpush.msra.mxu1 %v109_v29 }
   0xb   :  { %v69_v5 = vmul.f32 8.0, %v264_v4  ;;  %vm73_vm2 = vweird.f32 %v264_v4  ;;  %203 = vmatpush.msra.mxu2 %v177_v2 }
   0xd   :  { %v70_v6 = vsub.f32 1.0, %v69_v5 }
   0xf   :  { %v71_v10 = vmul.f32 %v264_v4, %v70_v6 }
  0x11   :  { %v72_v13 = vadd.f32 %v264_v4, %v71_v10 }
  0x13   :  { %v361_v16 = vsel %vm73_vm2, %v264_v4, %v72_v13  ;;  %v260_v13 = vld [vmem:[%s419_s5] ss:$0 sm:$0xff]  ;;  %s300_s5 = smov [#allocation2]  }
  0x82   :  { %v57_v7 = vpop.f32.mrf.mxu0 }
  0x83   :  { %v61_v8 = vsel %vm60_vm1, %v57_v7, 0.0 }
  0x84   :  { %v62_v9 = vrot.slane %v61_v8, 4 }
  0x86   :  { %v63_v11 = vadd.f32 %v62_v9, %v61_v8 }
  0x88   :  { %v64_v12 = vrot.slane %v63_v11, 2 }
  0x8a   :  { %v65_v14 = vadd.f32 %v64_v12, %v63_v11 }
  0x8c   :  { %v66_v15 = vrot.slane %v65_v14, 1 }
  0x8e   :  { %v67_v17 = vadd.f32 %v66_v15, %v65_v14 }
  0x90   :  { %v75_v18 = vmul.f32 %v361_v16, %v67_v17 }
  0x92   :  { %v76_v19 = vsub.f32 %v57_v7, %v75_v18 }
  0x94   :  { %v77_v20 = vmul.f32 %v76_v19, %v76_v19 }
  0x96   :  { %v78_v21 = vsel %vm60_vm1, %v77_v20, 0.0  ;;  %v208_v20 = vlaneseq }
  0x97   :  { %v79_v22 = vrot.slane %v78_v21, 4 }
  0x99   :  { %v80_v23 = vadd.f32 %v79_v22, %v78_v21  ;;  %v209_v21 = vand.u32 127, %v208_v20  ;;  %v262_v22 = vld [vmem:[%s422_s8] ss:$0 sm:$0xff] }
  0x9b   :  { %v81_v25 = vrot.slane %v80_v23, 2  ;;  %vm210_vm9 = vcmp.lt.s32.totalorder %v209_v21, 8 }
  0x9d   :  { %v82_v28 = vadd.f32 %v81_v25, %v80_v23 }
  0x9f   :  { %v83_v30 = vrot.slane %v82_v28, 1 }
  0xa1   :  { %v84_v31 = vadd.f32 %v83_v30, %v82_v28 }
  0xa3   :  { %v85_v32 = vmul.f32 %v84_v31, %v361_v16 }
  0xa5   :  { %v86_v33 = vadd.f32 1e-05, %v85_v32 }
  0xa7   :  { %265 = vrsqrt.f32 %v86_v33  ;;  %vm93_vm4 = vweird.f32 %v86_v33 }
  0xad   :  { %v266_v34 = vpop.eup %265 }
  0xae   :  { %v88_v35 = vmul.f32 %v266_v34, %v86_v33  ;;  %vm94_vm3 = vweird.f32 %v266_v34 }
  0xaf   :  { %vm95_vm5 = vmor %vm93_vm4, %vm94_vm3 }
  0xb0   :  { %v89_v36 = vmul.f32 %v266_v34, %v88_v35 }
  0xb2   :  { %v90_v37 = vmul.f32 0.5, %v89_v36 }
  0xb4   :  { %v91_v38 = vsub.f32 1.5, %v90_v37 }
  0xb6   :  { %v92_v39 = vmul.f32 %v266_v34, %v91_v38 }
  0xb8   :  { %v96_v41 = vsel %vm95_vm5, %v266_v34, %v92_v39 }
  0xb9   :  { %v97_v42 = vmul.f32 %v96_v41, %v76_v19 }
  0xbb   :  { %v102_v44 = vmul.f32 %v258_v40, %v97_v42 }
  0xbd   :  { %v107_v45 = vadd.f32 %v259_v43, %v102_v44 }
  0xbf   :  { %v108_v46 = vmax.f32 %v107_v45, 0.0 }
  0xc1   :  { %254 = vmatmul.msk.f32.vlgmr.msra.gmra.mxu1 %vm60_vm1, %v108_v46 }
 0x13e   :  { %v133_v47 = vpop.f32.mrf.mxu1 }
 0x13f   :  { %v136_v48 = vsel %vm60_vm1, %v133_v47, 0.0 }
 0x140   :  { %v137_v49 = vrot.slane %v136_v48, 4 }
 0x142   :  { %v138_v50 = vadd.f32 %v137_v49, %v136_v48 }
 0x144   :  { %v139_v51 = vrot.slane %v138_v50, 2 }
 0x146   :  { %v140_v52 = vadd.f32 %v139_v51, %v138_v50 }
 0x148   :  { %v141_v53 = vrot.slane %v140_v52, 1 }
 0x14a   :  { %v142_v54 = vadd.f32 %v141_v53, %v140_v52 }
 0x14c   :  { %v143_v55 = vmul.f32 %v142_v54, %v361_v16 }
 0x14e   :  { %v144_v56 = vsub.f32 %v133_v47, %v143_v55 }
 0x150   :  { %v145_v57 = vmul.f32 %v144_v56, %v144_v56 }
 0x152   :  { %v146_v58 = vsel %vm60_vm1, %v145_v57, 0.0 }
 0x153   :  { %v147_v59 = vrot.slane %v146_v58, 4 }
 0x155   :  { %v148_v60 = vadd.f32 %v147_v59, %v146_v58 }
 0x157   :  { %v149_v62 = vrot.slane %v148_v60, 2 }
 0x159   :  { %v150_v1 = vadd.f32 %v149_v62, %v148_v60 }
 0x15b   :  { %v151_v3 = vrot.slane %v150_v1, 1 }
 0x15d   :  { %v152_v4 = vadd.f32 %v151_v3, %v150_v1 }
 0x15f   :  { %v153_v5 = vmul.f32 %v152_v4, %v361_v16  ;;  %v261_v16 = vld [vmem:[%s420_s6] ss:$0 sm:$0xff]  ;;  %s242_s6 = sshll.u32 %s300_s5, 4  ;;  %s243_s6 = int_to_ptr.vmem [resolvable:$true] %s242_s6 }
 0x161   :  { %v154_v6 = vadd.f32 1e-05, %v153_v5 }
 0x163   :  { %267 = vrsqrt.f32 %v154_v6  ;;  %vm161_vm7 = vweird.f32 %v154_v6 }
 0x169   :  { %v268_v7 = vpop.eup %267 }
 0x16a   :  { %v156_v8 = vmul.f32 %v268_v7, %v154_v6  ;;  %vm162_vm6 = vweird.f32 %v268_v7 }
 0x16b   :  { %vm163_vm8 = vmor %vm161_vm7, %vm162_vm6 }
 0x16c   :  { %v157_v9 = vmul.f32 %v268_v7, %v156_v8 }
 0x16e   :  { %v158_v10 = vmul.f32 0.5, %v157_v9 }
 0x170   :  { %v159_v11 = vsub.f32 1.5, %v158_v10 }
 0x172   :  { %v160_v12 = vmul.f32 %v268_v7, %v159_v11 }
 0x174   :  { %v164_v14 = vsel %vm163_vm8, %v268_v7, %v160_v12 }
 0x175   :  { %v165_v15 = vmul.f32 %v164_v14, %v144_v56 }
 0x177   :  { %v170_v17 = vmul.f32 %v260_v13, %v165_v15 }
 0x179   :  { %v175_v18 = vadd.f32 %v261_v16, %v170_v17 }
 0x17b   :  { %v176_v19 = vmax.f32 %v175_v18, 0.0 }
 0x17d   :  { %255 = vmatmul.msk.f32.vlgmr.msra.gmra.mxu2 %vm60_vm1, %v176_v19 }
 0x200   :  { %v205_v23 = vpop.f32.mrf.mxu2 }
 0x201   :  { %v206_v24 = vadd.f32 %v262_v22, %v205_v23 }
 0x203   :  { %v211_v25 = vsel %vm210_vm9, %v206_v24, -1e+30 }
 0x204   :  { %212 = vmax.xlane.f32.xlu0 %v211_v25 }
 0x277   :  { %v213_v26 = vpop.xlane.xlu0 %212 }
 0x278   :  { %v214_v27 = vsub.f32 %v206_v24, %v213_v26 }
 0x27a   :  { %v215_v28 = vmul.f32 1.442695, %v214_v27 }
 0x27c   :  { %269 = vpow2.f32 %v215_v28 }
 0x282   :  { %v270_v29 = vpop.eup %269 }
 0x283   :  { %v217_v30 = vsel %vm210_vm9, %v270_v29, 0.0 }
 0x284   :  { %218 = vadd.xlane.f32.xlu0 %v217_v30 }
 0x2f7   :  { %v219_v31 = vpop.xlane.xlu0 %218 }
 0x2f8   :  { %271 = vrcp.f32 %v219_v31  ;;  %v231_v35 = vand.u32 2147483648, %v219_v31  ;;  %v229_v37 = vand.u32 2147483647, %v219_v31  ;;  %vm225_vm11 = vweird.f32 %v219_v31 }
 0x2fa   :  { %v232_v39 = vor.u32 1.1754944e-38, %v231_v35  ;;  %vm230_vm13 = vcmp.eq.f32.partialorder %v229_v37, 8.507059e+37 }
 0x2fe   :  { %v272_v32 = vpop.eup %271 }
 0x2ff   :  { %v221_v33 = vmul.f32 %v272_v32, %v219_v31  ;;  %vm226_vm10 = vweird.f32 %v272_v32 }
 0x300   :  { %vm227_vm12 = vmor %vm225_vm11, %vm226_vm10 }
 0x301   :  { %v222_v34 = vsub.f32 1.0, %v221_v33 }
 0x303   :  { %v223_v36 = vmul.f32 %v272_v32, %v222_v34 }
 0x305   :  { %v224_v38 = vadd.f32 %v272_v32, %v223_v36 }
 0x307   :  { %v228_v40 = vsel %vm227_vm12, %v272_v32, %v224_v38 }
 0x308   :  { %v233_v41 = vsel %vm230_vm13, %v232_v39, %v228_v40 }
 0x309   :  { %v235_v42 = vmul.f32 %v233_v41, %v217_v30 }
 0x30b   :  { %236 = vst [vmem:[#allocation2] sm:$0xff] %v235_v42 }
 0x30c   :  { %247 = dma.vmem_to_hbm [thread:$0]  %s243_s6, 128, %s245_s0, [#allocation3]  }
 0x30d   :  { %297 = dma.done.wait [#allocation3], 128  }
 0x30e   :  { %298 = vsyncadd [#allocation3], 4294967168 }
 0x30f   :  { %252 = vsyncpa [#allocation3], 1 }

</bundles_post_ra>
